<compile_context>
chip_gen: v7x
topology: tpu7x:2x2x1
jax: 0.10.0
libtpu: 0.0.40
codegen_flags: <defaults>
</compile_context>

<pallas_src>
import functools

import jax
import jax.numpy as jnp
from jax.experimental import pallas as pl
from jax.experimental.pallas import tpu as pltpu


# Above the 32 MiB scoped default, below v7x's 64 MiB physical VMEM.
_VMEM_LIMIT_BYTES = 48 * 1024 * 1024


# --------------------------------------------------------------------------
# small utilities
# --------------------------------------------------------------------------

@functools.lru_cache(maxsize=None)
def _roll_is_forward() -> bool:
    """Detect pltpu.roll's rotation convention once (True => matches jnp.roll,
    i.e. out[i] = x[(i - shift) % n]) so the shift boundary masks stay correct
    regardless of the underlying rotate direction."""
    def kernel(x_ref, o_ref):
        o_ref[...] = pltpu.roll(x_ref[...], shift=1, axis=0)

    x = jnp.arange(8 * 128, dtype=jnp.float32).reshape(8, 128)
    y = pl.pallas_call(kernel, out_shape=jax.ShapeDtypeStruct((8, 128), jnp.float32))(x)
    return bool(y[1, 0] == x[0, 0])


def _maybe_buffered(block_shape, index_map, nbuf):
    """Deeper input pipelining (hides DMA when per-tile compute is tiny)."""
    try:
        return pl.BlockSpec(block_shape, index_map, pipeline_mode=pl.Buffered(nbuf))
    except Exception:  # older jax without pipeline_mode / Buffered
        return pl.BlockSpec(block_shape, index_map)


def _choose_block_rows(w, h, c, max_block_bytes=512 * 1024):
    """Largest divisor of w whose bf16 x tile (rows*h, c) stays under the budget.
    In-kernel f32 intermediates are ~10x the bf16 tile, so 512 KiB keeps the
    working set ~10 MiB -- comfortably inside v7x's 64 MiB VMEM while giving
    512-1024+ pixel rows per tile at production channel counts."""
    best = 1
    for tw in range(1, w + 1):
        if w % tw == 0 and tw * h * c * 2 <= max_block_bytes:
            best = tw
    return best


# --------------------------------------------------------------------------
# in-kernel building blocks
# --------------------------------------------------------------------------

def _mlp1(x_tile, w1_ref, b1_ref):
    # bf16 tile @ bf16 weight -> f32 accumulate, f32 bias add.
    return jnp.dot(x_tile, w1_ref[...], preferred_element_type=jnp.float32) + b1_ref[...]


def _shifted_branches(y, yp, yn, col, h, c, roll_fwd):
    """Apply spatial_shift1 / spatial_shift2 on the fly to the three c-wide
    branches of y.

    y   : (tS, 3c) f32  mlp1 output for tS = tw*h pixels (tw full image rows)
    yp  : (h,  3c) f32  mlp1 output for the image row just above the tile (clamped)
    yn  : (h,  3c) f32  mlp1 output for the image row just below the tile (clamped)
    col : (tS, 1)  i32  position of each pixel inside its image row (0..h-1)
    """
    tS = y.shape[0]
    q = c // 4
    cidx = jax.lax.broadcasted_iota(jnp.int32, (tS, c), 1)
    colf = jnp.broadcast_to(col, (tS, c))
    s_m1 = 1 if roll_fwd else tS - 1   # roll amount producing out[s] = y[s-1]
    s_p1 = tS - 1 if roll_fwd else 1   # roll amount producing out[s] = y[s+1]

    def down_w(b2d, bprev):   # out[i, j] = y[i-1, j]; image row 0 keeps itself (halo clamped)
        return jnp.concatenate([bprev, b2d[: tS - h, :]], axis=0)

    def up_w(b2d, bnext):     # out[i, j] = y[i+1, j]; last image row keeps itself
        return jnp.concatenate([b2d[h:, :], bnext], axis=0)

    def right_h(b2d):         # out[i, j] = y[i, j-1]; column 0 keeps itself
        rolled = pltpu.roll(b2d, shift=s_m1, axis=0)
        return jnp.where(colf == 0, b2d, rolled)

    def left_h(b2d):          # out[i, j] = y[i, j+1]; column h-1 keeps itself
        rolled = pltpu.roll(b2d, shift=s_p1, axis=0)
        return jnp.where(colf == h - 1, b2d, rolled)

    def pick(v0, v1, v2, v3):  # channel-group select (c//4-wide groups, no lane slicing)
        return jnp.where(cidx < q, v0,
               jnp.where(cidx < 2 * q, v1,
               jnp.where(cidx < 3 * q, v2, v3)))

    y1, y2, y3 = y[:, :c], y[:, c:2 * c], y[:, 2 * c:]
    y1p, y2p = yp[:, :c], yp[:, c:2 * c]
    y1n, y2n = yn[:, :c], yn[:, c:2 * c]

    x1 = pick(down_w(y1, y1p), up_w(y1, y1n), right_h(y1), left_h(y1))   # spatial_shift1
    x2 = pick(right_h(y2), left_h(y2), down_w(y2, y2p), up_w(y2, y2n))   # spatial_shift2
    x3 = y3
    return x1, x2, x3


# --------------------------------------------------------------------------
# kernel 1: mlp1 + shifts + global (k, spatial) reduction
# --------------------------------------------------------------------------

def _mlp1_shift_sum_kernel(x_ref, xp_ref, xn_ref, col_ref, w1_ref, b1_ref,
                           a_ref, acc_ref, *, h, c, roll_fwd):
    wi = pl.program_id(1)

    y = _mlp1(x_ref[0], w1_ref, b1_ref)          # (tS, 3c) f32
    yp = _mlp1(xp_ref[0], w1_ref, b1_ref)        # (h,  3c)
    yn = _mlp1(xn_ref[0], w1_ref, b1_ref)        # (h,  3c)
    x1, x2, x3 = _shifted_branches(y, yp, yn, col_ref[...], h, c, roll_fwd)

    partial = jnp.sum(x1 + x2 + x3, axis=0, keepdims=True)     # (1, c) f32

    @pl.when(wi == 0)
    def _init():
        acc_ref[...] = jnp.zeros_like(acc_ref)

    acc_ref[...] += partial

    @pl.when(wi == pl.num_programs(1) - 1)
    def _flush():
        a_ref[0] = acc_ref[...]


def _fused_mlp1_shift_sum(x_slab, col_ids, w1, b1, *, w, h, c, tw, roll_fwd):
    b = x_slab.shape[0]
    tS = tw * h
    nw = w // tw
    kern = functools.partial(_mlp1_shift_sum_kernel, h=h, c=c, roll_fwd=roll_fwd)
    a = pl.pallas_call(
        kern,
        out_shape=jax.ShapeDtypeStruct((b, 1, c), jnp.float32),
        grid_spec=pltpu.PrefetchScalarGridSpec(
            num_scalar_prefetch=0,
            grid=(b, nw),
            in_specs=[
                pl.BlockSpec((1, tS, c), lambda bi, wi: (bi, wi, 0)),
                # halo image rows (block unit = one image row = h pixels), clamped
                pl.BlockSpec((1, h, c), lambda bi, wi: (bi, jnp.maximum(wi * tw - 1, 0), 0)),
                pl.BlockSpec((1, h, c), lambda bi, wi: (bi, jnp.minimum((wi + 1) * tw, w - 1), 0)),
                pl.BlockSpec((tS, 1), lambda bi, wi: (0, 0)),
                pl.BlockSpec((c, 3 * c), lambda bi, wi: (0, 0)),
                pl.BlockSpec((1, 3 * c), lambda bi, wi: (0, 0)),
            ],
            out_specs=pl.BlockSpec((1, 1, c), lambda bi, wi: (bi, 0, 0)),
            scratch_shapes=[pltpu.VMEM((1, c), jnp.float32)],
        ),
        compiler_params=pltpu.CompilerParams(
            dimension_semantics=("parallel", "arbitrary"),
            vmem_limit_bytes=_VMEM_LIMIT_BYTES),
    )(x_slab, x_slab, x_slab, col_ids, w1, b1)
    return a.reshape(b, c)


# --------------------------------------------------------------------------
# kernel 2: mlp1 (recomputed) + shifts + attention-weighted sum + mlp2
# --------------------------------------------------------------------------

def _mlp1_shift_attn_mlp2_kernel(x_ref, xp_ref, xn_ref, col_ref, attn_ref,
                                 w1_ref, b1_ref, w2_ref, b2_ref, o_ref,
                                 *, h, c, roll_fwd):
    y = _mlp1(x_ref[0], w1_ref, b1_ref)
    yp = _mlp1(xp_ref[0], w1_ref, b1_ref)
    yn = _mlp1(xn_ref[0], w1_ref, b1_ref)
    x1, x2, x3 = _shifted_branches(y, yp, yn, col_ref[...], h, c, roll_fwd)

    a = attn_ref[0]                                                   # (3, c) f32
    combined = a[0:1, :] * x1 + a[1:2, :] * x2 + a[2:3, :] * x3       # (tS, c) f32

    out = jnp.dot(combined.astype(w2_ref.dtype), w2_ref[...],
                  preferred_element_type=jnp.float32) + b2_ref[...]
    o_ref[0] = out.astype(o_ref.dtype)


def _fused_mlp1_shift_attn_mlp2(x_slab, col_ids, attn, w1, b1, w2, b2,
                                *, w, h, c, tw, roll_fwd):
    b, S, _ = x_slab.shape
    tS = tw * h
    nw = w // tw
    kern = functools.partial(_mlp1_shift_attn_mlp2_kernel, h=h, c=c, roll_fwd=roll_fwd)
    return pl.pallas_call(
        kern,
        out_shape=jax.ShapeDtypeStruct((b, S, c), jnp.float32),
        grid_spec=pltpu.PrefetchScalarGridSpec(
            num_scalar_prefetch=0,
            grid=(b, nw),
            in_specs=[
                _maybe_buffered((1, tS, c), lambda bi, wi: (bi, wi, 0), 3),
                pl.BlockSpec((1, h, c), lambda bi, wi: (bi, jnp.maximum(wi * tw - 1, 0), 0)),
                pl.BlockSpec((1, h, c), lambda bi, wi: (bi, jnp.minimum((wi + 1) * tw, w - 1), 0)),
                pl.BlockSpec((tS, 1), lambda bi, wi: (0, 0)),
                pl.BlockSpec((1, 3, c), lambda bi, wi: (bi, 0, 0)),
                pl.BlockSpec((c, 3 * c), lambda bi, wi: (0, 0)),
                pl.BlockSpec((1, 3 * c), lambda bi, wi: (0, 0)),
                pl.BlockSpec((c, c), lambda bi, wi: (0, 0)),
                pl.BlockSpec((1, c), lambda bi, wi: (0, 0)),
            ],
            out_specs=pl.BlockSpec((1, tS, c), lambda bi, wi: (bi, wi, 0)),
        ),
        compiler_params=pltpu.CompilerParams(
            dimension_semantics=("parallel", "parallel"),
            vmem_limit_bytes=_VMEM_LIMIT_BYTES),
    )(x_slab, x_slab, x_slab, col_ids, attn, w1, b1, w2, b2)


# --------------------------------------------------------------------------
# public forward (NCHW in / NCHW out, like the PyTorch module)
# --------------------------------------------------------------------------

def s2_attention(x_nchw, p, *, block_rows=None, act_dtype=jnp.bfloat16, roll_fwd=None):
    b, c, w, h = x_nchw.shape
    assert c % 128 == 0, "channels must be a multiple of 128 (pad channels otherwise)"
    assert h % 8 == 0, "inner spatial dim must be a multiple of 8 (sublane-aligned halo)"
    if block_rows is None:
        block_rows = _choose_block_rows(w, h, c)
    tw = block_rows
    assert w % tw == 0, "w must be divisible by the chosen block_rows"
    if roll_fwd is None:
        roll_fwd = _roll_is_forward()

    S = w * h
    tS = tw * h

    # NCHW -> (b, S, c) channel-last slab, cast to bf16 in the same XLA pass.
    # TODO(synk): this transpose (and the inverse one on the output) could also be
    # folded into the kernels by blocking x as (1, c, tS) and transposing on-chip;
    # kept as single XLA ops here for lowering robustness.
    x_slab = jnp.transpose(x_nchw, (0, 2, 3, 1)).reshape(b, S, c).astype(act_dtype)
    w1 = p["w_mlp1"].astype(act_dtype)
    b1 = p["b_mlp1"].reshape(1, 3 * c).astype(jnp.float32)
    w2 = p["w_mlp2"].astype(act_dtype)
    b2 = p["b_mlp2"].reshape(1, c).astype(jnp.float32)
    col_ids = (jnp.arange(tS, dtype=jnp.int32) % h).reshape(tS, 1)

    # Pass 1: per-batch channel vector a = sum_{k,spatial} shifted branches.
    a = _fused_mlp1_shift_sum(x_slab, col_ids, w1, b1,
                              w=w, h=h, c=c, tw=tw, roll_fwd=roll_fwd)     # (b, c) f32

    # Tiny (b,c)->(b,3,c) gating MLP (exact erf-GELU + softmax over k).
    # TODO(synk): kept in plain JAX -- negligible FLOPs and erf lowering inside
    # Mosaic is not guaranteed on all generations.
    hat = jax.nn.gelu(a @ p["w_sa1"], approximate=False) @ p["w_sa2"]
    attn = jax.nn.softmax(hat.reshape(b, 3, c), axis=1).astype(jnp.float32)

    # Pass 2: attention-weighted branch sum fused with mlp2 (lane-dense output).
    out = _fused_mlp1_shift_attn_mlp2(x_slab, col_ids, attn, w1, b1, w2, b2,
                                      w=w, h=h, c=c, tw=tw, roll_fwd=roll_fwd)  # (b,S,c) f32
    return jnp.transpose(out.reshape(b, w, h, c), (0, 3, 1, 2))


# --------------------------------------------------------------------------
# pure-JAX reference (mirrors the PyTorch forward, same bf16 carry as kernels)
# --------------------------------------------------------------------------

def spatial_shift1(x):
    b, w, h, c = x.shape
    g0 = jnp.concatenate([x[:, :1, :, : c // 4], x[:, : w - 1, :, : c // 4]], axis=1)
    g1 = jnp.concatenate([x[:, 1:, :, c // 4: c // 2], x[:, w - 1:, :, c // 4: c // 2]], axis=1)
    g2 = jnp.concatenate([x[:, :, :1, c // 2: 3 * c // 4], x[:, :, : h - 1, c // 2: 3 * c // 4]], axis=2)
    g3 = jnp.concatenate([x[:, :, 1:, 3 * c // 4:], x[:, :, h - 1:, 3 * c // 4:]], axis=2)
    return jnp.concatenate([g0, g1, g2, g3], axis=-1)


def spatial_shift2(x):
    b, w, h, c = x.shape
    g0 = jnp.concatenate([x[:, :, :1, : c // 4], x[:, :, : h - 1, : c // 4]], axis=2)
    g1 = jnp.concatenate([x[:, :, 1:, c // 4: c // 2], x[:, :, h - 1:, c // 4: c // 2]], axis=2)
    g2 = jnp.concatenate([x[:, :1, :, c // 2: 3 * c // 4], x[:, : w - 1, :, c // 2: 3 * c // 4]], axis=1)
    g3 = jnp.concatenate([x[:, 1:, :, 3 * c // 4:], x[:, w - 1:, :, 3 * c // 4:]], axis=1)
    return jnp.concatenate([g0, g1, g2, g3], axis=-1)


def s2_attention_ref(x_nchw, p, act_dtype=jnp.bfloat16):
    b, c, w, h = x_nchw.shape
    x = jnp.transpose(x_nchw, (0, 2, 3, 1)).astype(act_dtype)            # (b, w, h, c)
    y = jnp.dot(x.reshape(b * w * h, c), p["w_mlp1"].astype(act_dtype),
                preferred_element_type=jnp.float32)
    y = y.reshape(b, w, h, 3 * c) + p["b_mlp1"]
    x1 = spatial_shift1(y[..., :c])
    x2 = spatial_shift2(y[..., c: 2 * c])
    x3 = y[..., 2 * c:]
    x_all = jnp.stack([x1, x2, x3], axis=1).reshape(b, 3, w * h, c)
    a = jnp.sum(jnp.sum(x_all, axis=1), axis=1)
    hat = jax.nn.gelu(a @ p["w_sa1"], approximate=False) @ p["w_sa2"]
    bar = jax.nn.softmax(hat.reshape(b, 3, c), axis=1)
    comb = jnp.sum(bar[:, :, None, :] * x_all, axis=1).reshape(b * w * h, c)
    out = jnp.dot(comb.astype(act_dtype), p["w_mlp2"].astype(act_dtype),
                  preferred_element_type=jnp.float32) + p["b_mlp2"]
    return jnp.transpose(out.reshape(b, w, h, c), (0, 3, 1, 2))


def init_params(key, c):
    # Deterministic synthetic parameters; weights stored (in, out) so y = x @ W + b.
    ks = jax.random.split(key, 6)
    s = 0.05
    return {
        "w_mlp1": s * jax.random.normal(ks[0], (c, 3 * c), jnp.float32),   # Linear(c, 3c)
        "b_mlp1": s * jax.random.normal(ks[1], (3 * c,), jnp.float32),
        "w_sa1": s * jax.random.normal(ks[2], (c, c), jnp.float32),        # SplitAttention.mlp1
        "w_sa2": s * jax.random.normal(ks[3], (c, 3 * c), jnp.float32),    # SplitAttention.mlp2
        "w_mlp2": s * jax.random.normal(ks[4], (c, c), jnp.float32),       # Linear(c, c)
        "b_mlp2": s * jax.random.normal(ks[5], (c,), jnp.float32),
    }


if __name__ == "__main__":
    # channels multiple of 128 (lane-dense), h multiple of 8 (aligned halo rows).
    b, c, w, h = 2, 128, 16, 16
    key = jax.random.PRNGKey(0)
    kx, kp = jax.random.split(key)
    x = jax.random.normal(kx, (b, c, w, h), jnp.float32)
    params = init_params(kp, c)

    # block_rows=8 -> two spatial tiles per image: exercises the halo rows and
    # the accumulator path across the "arbitrary" grid axis.
    out = jax.block_until_ready(s2_attention(x, params, block_rows=8))
    assert out.shape == (b, c, w, h) and out.dtype == jnp.float32

    ref = s2_attention_ref(x, params)
    err = float(jnp.max(jnp.abs(out - ref)))
    assert err < 5e-3, f"mismatch vs reference: {err}"
    print("KERNEL_OK")
</pallas_src>

<mosaic_0001>
module attributes {stable_mosaic.version = 11 : i64} {
  func.func @kernel(%arg0: memref<8x128xf32, #tpu.memory_space<vmem>>, %arg1: memref<8x128xf32, #tpu.memory_space<vmem>>) attributes {dimension_semantics = [], scalar_prefetch = 0 : i64, scratch_operands = 0 : i64, tpu.core_type = #tpu.core_type<tc>} {
    %c0 = arith.constant 0 : index
    %c0_0 = arith.constant 0 : index
    %0 = vector.load %arg0[%c0, %c0_0] : memref<8x128xf32, #tpu.memory_space<vmem>>, vector<8x128xf32>
    %c1_i32 = arith.constant 1 : i32
    %1 = tpu.dynamic_rotate %0 by %c1_i32 dim 0 : vector<8x128xf32>, i32 -> vector<8x128xf32>
    %c0_1 = arith.constant 0 : index
    %c0_2 = arith.constant 0 : index
    %2 = vector.load %arg1[%c0_1, %c0_2] : memref<8x128xf32, #tpu.memory_space<vmem>>, vector<8x128xf32>
    tpu.vector_store %arg1[%c0_1, %c0_2], %1 {strides = array<i32>} : memref<8x128xf32, #tpu.memory_space<vmem>>, vector<8x128xf32>,
    return
  }
}

</mosaic_0001>

<bundles_post_ra>
// kernel: tpu_custom_call.1
= control target key start
LH: loop header
LB: loop body
LE: loop exit
PB: predicated region body
PF: predicated region fallthrough
CT: control target
= control target key end

     0   :  { %6 = vsyncpa [#allocation3], 0  ;;  %s125_s0 = inlined_call_operand.hbm [shape: f32[8,128], index: 0, kind: input, shape index: {}]   ;;  %s126_s1 = inlined_call_operand.hbm [shape: f32[8,128], index: 1, kind: output, shape index: {}]  }
   0x1   :  { %7 = vsyncpa [#allocation4], 0  ;;  %s89_s6 = smov [#allocation2]   ;;  %s41_s10 = scalar_lea.hbm %s125_s0, 128 }
   0x2   :  { %s14_s7 = sshll.u32 %s89_s6, 4  ;;  %p42_p0 = scmp.ne.s32.totalorder %s125_s0, %s41_s10  ;;  %s15_s7 = int_to_ptr.vmem [resolvable:$true] %s14_s7 }
   0x3   :  { %p45_p1 = scmp.lt.u32.totalorder %s41_s10, %s125_s0 }
   0x5   :  { %p47_p2 = pnand %p45_p1, %p42_p0 }
   0x7   :  { %50 = shalt.err (!%p47_p2)
}
   0x8   :  { %s51_s15 = scalar_lea.vmem %s15_s7, 128  ;;  %p56_p4 = scmp.lt.s32.totalorder %s15_s7, %s15_s7 }
   0x9   :  { %p52_p3 = scmp.ne.s32.totalorder %s15_s7, %s51_s15  ;;  %p57_p5 = scmp.lt.s32.totalorder %s51_s15, %s51_s15 }
   0xb   :  { %p58_p6 = por %p57_p5, %p56_p4 }
   0xd   :  { %p59_p7 = pnand %p58_p6, %p52_p3 }
   0xf   :  { %62 = shalt.err (!%p59_p7)
}
  0x10   :  { %17 = dma.hbm_to_vmem [thread:$0]  %s125_s0, 128, %s15_s7, [#allocation3]  }
  0x11   :  { %85 = dma.done.wait [#allocation3], 128  }
  0x12   :  { %86 = vsyncadd [#allocation3], 4294967168  ;;  %s90_s18 = smov [#allocation5]   ;;  %v21_v0 = vld [vmem:[#allocation2] sm:$0xff] }
  0x13   :  { %s30_s19 = sshll.u32 %s90_s18, 4  ;;  %v22_v1 = vrot.slane %v21_v0, 7  ;;  %s31_s19 = int_to_ptr.vmem [resolvable:$true] %s30_s19 }
  0x14   :  { %s63_s20 = scalar_lea.vmem %s31_s19, 128  ;;  %p68_p9 = scmp.lt.s32.totalorder %s31_s19, %s31_s19 }
  0x15   :  { %23 = vst [vmem:[#allocation5] sm:$0xff] %v22_v1  ;;  %p64_p8 = scmp.ne.s32.totalorder %s31_s19, %s63_s20  ;;  %p69_p10 = scmp.lt.s32.totalorder %s63_s20, %s63_s20 }
  0x17   :  { %p70_p11 = por %p69_p10, %p68_p9 }
  0x19   :  { %p71_p12 = pnand %p70_p11, %p64_p8 }
  0x1b   :  { %74 = shalt.err (!%p71_p12)
}
  0x1c   :  { %s75_s23 = scalar_lea.hbm %s126_s1, 128 }
  0x1d   :  { %p76_p13 = scmp.ne.s32.totalorder %s126_s1, %s75_s23  ;;  %p79_p0 = scmp.lt.u32.totalorder %s75_s23, %s126_s1 }
  0x1f   :  { %p81_p1 = pnand %p79_p0, %p76_p13 }
  0x21   :  { %84 = shalt.err (!%p81_p1)
}
  0x22   :  { %33 = dma.vmem_to_hbm [thread:$0]  %s31_s19, 128, %s126_s1, [#allocation4]  }
  0x23   :  { %87 = dma.done.wait [#allocation4], 128  }
  0x24   :  { %88 = vsyncadd [#allocation4], 4294967168 }
  0x25   :  { %37 = vsyncpa [#allocation3], 1 }
  0x26   :  { %38 = vsyncpa [#allocation4], 1 }

</bundles_post_ra>
